<compile_context>
chip_gen: v6e
topology: v6e:2x2x1
jax: 0.10.0
libtpu: 0.0.40
codegen_flags: <defaults>
</compile_context>

<pallas_src>
import jax
import jax.numpy as jnp
from jax import lax
from jax.experimental import pallas as pl
from jax.experimental.pallas import tpu as pltpu

LANE = 128
SUBLANE = 8
HIDDEN1 = 128
HIDDEN2 = 32
SUB_TILE = 256                 # inner sub-tile (rows) processed per fori_loop step
DEFAULT_BATCH_TILE = 2048      # per-grid-step rows; sweep 1024-8192 for peak


def _cdiv(a, b):
    return -(-a // b)


def _round_up(n, m):
    return _cdiv(n, m) * m


def _pick_tile(rows):
    """Round a row count up to a legal, well-aligned batch-tile size."""
    if rows >= SUB_TILE:
        return _round_up(rows, SUB_TILE)
    return _round_up(max(rows, SUBLANE), SUBLANE)


def qnet_mean_kernel(x_ref, w1_ref, b1_ref, w2_ref, b2_ref, w3_ref, b3_ref,
                     o_ref):
    b_tile = x_ref.shape[0]
    # Process the batch tile in SUB_TILE-row chunks so the f32 intermediates
    # stay small even when b_tile is large (keeps vreg/VMEM pressure low).
    sub = SUB_TILE if (b_tile % SUB_TILE == 0) else b_tile
    n_sub = b_tile // sub

    # Resident operands (loaded once per grid step; weights are VMEM-resident
    # across the whole grid thanks to their constant index_map).
    w1 = w1_ref[...]
    b1 = b1_ref[...]
    w2 = w2_ref[...]
    b2 = b2_ref[...]
    w3 = w3_ref[...]
    b3 = b3_ref[...]

    def body(s, carry):
        r0 = pl.multiple_of(s * sub, sub)

        # Layer 1: (sub, D_in) @ (D_in, 128) + b1, ReLU. bf16 in, f32 acc.
        x = x_ref[pl.ds(r0, sub), :].astype(jnp.bfloat16)
        h1 = jnp.dot(x, w1, preferred_element_type=jnp.float32)
        h1 = jnp.maximum(h1 + b1, 0.0)

        # Layer 2: (sub, 128) @ (128, 128pad) + b2, ReLU. Padded lanes stay 0.
        h2 = jnp.dot(h1.astype(jnp.bfloat16), w2,
                     preferred_element_type=jnp.float32)
        h2 = jnp.maximum(h2 + b2, 0.0)

        # Layer 3: (sub, 128pad) @ (128pad, out_dim) + b3 -> narrow store.
        out = jnp.dot(h2.astype(jnp.bfloat16), w3,
                      preferred_element_type=jnp.float32)
        o_ref[pl.ds(r0, sub), :] = (out + b3).astype(o_ref.dtype)
        return carry

    lax.fori_loop(0, n_sub, body, 0, unroll=True)


def qnet_mean_forward(x, params, *, batch_tile=DEFAULT_BATCH_TILE):
    """Fused MLP forward. x: (B, input_dim) f32 or bf16 -> (B, output_dim) f32."""
    w1, b1, w2, b2, w3, b3 = params
    B, d_in = x.shape
    out_dim = w3.shape[1]

    # --- Pad only the narrow *contraction* width (32 -> 128). --------------
    # The output width stays at the true out_dim (no lane padding, no wrapper
    # lane slice): the kernel does a masked narrow store, which is free here
    # because the kernel is HBM-write bound, not store-slot bound.
    h2_pad = _round_up(HIDDEN2, LANE)
    w2_p = jnp.pad(w2, ((0, 0), (0, h2_pad - w2.shape[1])))
    b2_p = jnp.pad(b2, ((0, 0), (0, h2_pad - b2.shape[1])))
    w3_p = jnp.pad(w3, ((0, h2_pad - w3.shape[0]), (0, 0)))

    # bf16 matmul operands (halves weight traffic); biases stay f32.
    w1_b = w1.astype(jnp.bfloat16)
    w2_b = w2_p.astype(jnp.bfloat16)
    w3_b = w3_p.astype(jnp.bfloat16)

    # --- Batch tiling. ------------------------------------------------------
    if B > batch_tile:
        n_tiles = _cdiv(B, batch_tile)
        b_tile = _pick_tile(_cdiv(B, n_tiles))
    elif B >= 2 * SUB_TILE:
        # Prefer >=2 grid steps so v7x megacore ("parallel") splits the work.
        b_tile = _pick_tile(_cdiv(B, 2))
    else:
        b_tile = _pick_tile(B)

    B_pad = _round_up(B, b_tile)
    x_p = x if B_pad == B else jnp.pad(x, ((0, B_pad - B), (0, 0)))
    grid = (B_pad // b_tile,)

    def weight_spec(a):
        # Full-array block, constant index_map -> loaded once, VMEM-resident.
        return pl.BlockSpec(a.shape, lambda i: (0,) * a.ndim)

    out = pl.pallas_call(
        qnet_mean_kernel,
        out_shape=jax.ShapeDtypeStruct((B_pad, out_dim), jnp.float32),
        grid=grid,
        in_specs=[
            pl.BlockSpec((b_tile, d_in), lambda i: (i, 0)),   # x: batch-tiled
            weight_spec(w1_b), weight_spec(b1),
            weight_spec(w2_b), weight_spec(b2_p),
            weight_spec(w3_b), weight_spec(b3),
        ],
        out_specs=pl.BlockSpec((b_tile, out_dim), lambda i: (i, 0)),
        compiler_params=pltpu.CompilerParams(
            dimension_semantics=("parallel",),   # 2 TCs on v7x; no-op elsewhere
            vmem_limit_bytes=32 * 1024 * 1024,   # safe on v5e/v6e/v7x; >> footprint
        ),
    )(x_p, w1_b, b1, w2_b, b2_p, w3_b, b3)

    return out if B_pad == B else out[:B]


def init_params(key, input_dim, output_dim):
    """nn.Linear-style init (uniform +/- 1/sqrt(fan_in)).

    Weights stored pre-transposed as (in_features, out_features); biases as
    (1, out_features).
    """
    dims = [(input_dim, HIDDEN1), (HIDDEN1, HIDDEN2), (HIDDEN2, output_dim)]
    params = []
    for fan_in, fan_out in dims:
        key, kw, kb = jax.random.split(key, 3)
        bound = 1.0 / jnp.sqrt(jnp.float32(fan_in))
        w = jax.random.uniform(kw, (fan_in, fan_out), jnp.float32,
                               minval=-bound, maxval=bound)
        b = jax.random.uniform(kb, (1, fan_out), jnp.float32,
                               minval=-bound, maxval=bound)
        params.extend([w, b])
    return tuple(params)


def reference_forward_f32(x, params):
    """Pure-f32 JAX reference (PyTorch semantics)."""
    w1, b1, w2, b2, w3, b3 = params
    h1 = jnp.maximum(x @ w1 + b1, 0.0)
    h2 = jnp.maximum(h1 @ w2 + b2, 0.0)
    return h2 @ w3 + b3


def reference_forward_bf16(x, params):
    """Reference that mimics the kernel numerics (bf16 matmuls, f32 accum)."""
    w1, b1, w2, b2, w3, b3 = params
    bf = jnp.bfloat16
    h1 = jnp.maximum(jnp.dot(x.astype(bf), w1.astype(bf),
                             preferred_element_type=jnp.float32) + b1, 0.0)
    h2 = jnp.maximum(jnp.dot(h1.astype(bf), w2.astype(bf),
                             preferred_element_type=jnp.float32) + b2, 0.0)
    return jnp.dot(h2.astype(bf), w3.astype(bf),
                   preferred_element_type=jnp.float32) + b3


if __name__ == "__main__":
    key = jax.random.PRNGKey(0)
    input_dim, output_dim = 16, 4

    # --- Test 1: small, batch-unaligned, tiny batch_tile -> multi-step grid.
    batch = 50
    key, kx = jax.random.split(key)
    x = jax.random.normal(kx, (batch, input_dim), jnp.float32)
    params = init_params(key, input_dim, output_dim)

    out = qnet_mean_forward(x, params, batch_tile=16)
    out = jax.block_until_ready(out)

    ref_bf16 = reference_forward_bf16(x, params)
    ref_f32 = reference_forward_f32(x, params)
    assert out.shape == (batch, output_dim)
    assert jnp.allclose(out, ref_bf16, atol=1e-3, rtol=1e-3), "bf16-ref mismatch"
    assert jnp.allclose(out, ref_f32, atol=5e-2, rtol=5e-2), "f32-ref mismatch"

    # --- Test 2: medium batch, default tile -> split path + inner sub-tile loop.
    batch2 = 600
    key, kx2 = jax.random.split(key)
    x2 = jax.random.normal(kx2, (batch2, input_dim), jnp.float32)
    out2 = jax.block_until_ready(qnet_mean_forward(x2, params))
    ref2_bf16 = reference_forward_bf16(x2, params)
    ref2_f32 = reference_forward_f32(x2, params)
    assert out2.shape == (batch2, output_dim)
    assert jnp.allclose(out2, ref2_bf16, atol=1e-3, rtol=1e-3), "bf16-ref mismatch (t2)"
    assert jnp.allclose(out2, ref2_f32, atol=5e-2, rtol=5e-2), "f32-ref mismatch (t2)"

    print("KERNEL_OK")
</pallas_src>

<mosaic_0001>
module attributes {stable_mosaic.version = 11 : i64} {
  func.func @qnet_mean_kernel(%arg0: i32, %arg1: memref<16x16xf32, #tpu.memory_space<vmem>>, %arg2: memref<16x128xbf16, #tpu.memory_space<vmem>>, %arg3: memref<1x128xf32, #tpu.memory_space<vmem>>, %arg4: memref<128x128xbf16, #tpu.memory_space<vmem>>, %arg5: memref<1x128xf32, #tpu.memory_space<vmem>>, %arg6: memref<128x4xbf16, #tpu.memory_space<vmem>>, %arg7: memref<1x4xf32, #tpu.memory_space<vmem>>, %arg8: memref<16x4xf32, #tpu.memory_space<vmem>>) attributes {dimension_semantics = [#tpu.dimension_semantics<parallel>], iteration_bounds = array<i64: 4>, scalar_prefetch = 0 : i64, scratch_operands = 0 : i64, tpu.core_type = #tpu.core_type<tc>, window_params = [{transform_indices = @transform_0, window_bounds = array<i64: 16, 16>}, {pipeline_mode = #tpu.pipeline_mode<synchronous>, transform_indices = @transform_1, window_bounds = array<i64: 16, 128>}, {pipeline_mode = #tpu.pipeline_mode<synchronous>, transform_indices = @transform_2, window_bounds = array<i64: 1, 128>}, {pipeline_mode = #tpu.pipeline_mode<synchronous>, transform_indices = @transform_3, window_bounds = array<i64: 128, 128>}, {pipeline_mode = #tpu.pipeline_mode<synchronous>, transform_indices = @transform_4, window_bounds = array<i64: 1, 128>}, {pipeline_mode = #tpu.pipeline_mode<synchronous>, transform_indices = @transform_5, window_bounds = array<i64: 128, 4>}, {pipeline_mode = #tpu.pipeline_mode<synchronous>, transform_indices = @transform_6, window_bounds = array<i64: 1, 4>}, {transform_indices = @transform_7, window_bounds = array<i64: 16, 4>}]} {
    %c0 = arith.constant 0 : index
    %c0_0 = arith.constant 0 : index
    %0 = vector.load %arg2[%c0, %c0_0] : memref<16x128xbf16, #tpu.memory_space<vmem>>, vector<16x128xbf16>
    %c0_1 = arith.constant 0 : index
    %c0_2 = arith.constant 0 : index
    %1 = vector.load %arg3[%c0_1, %c0_2] : memref<1x128xf32, #tpu.memory_space<vmem>>, vector<1x128xf32>
    %c0_3 = arith.constant 0 : index
    %c0_4 = arith.constant 0 : index
    %2 = vector.load %arg4[%c0_3, %c0_4] : memref<128x128xbf16, #tpu.memory_space<vmem>>, vector<128x128xbf16>
    %c0_5 = arith.constant 0 : index
    %c0_6 = arith.constant 0 : index
    %3 = vector.load %arg5[%c0_5, %c0_6] : memref<1x128xf32, #tpu.memory_space<vmem>>, vector<1x128xf32>
    %c0_7 = arith.constant 0 : index
    %c0_8 = arith.constant 0 : index
    %4 = vector.load %arg6[%c0_7, %c0_8] : memref<128x4xbf16, #tpu.memory_space<vmem>>, vector<128x4xbf16>
    %c0_9 = arith.constant 0 : index
    %c0_10 = arith.constant 0 : index
    %5 = vector.load %arg7[%c0_9, %c0_10] : memref<1x4xf32, #tpu.memory_space<vmem>>, vector<1x4xf32>
    %c0_i32 = arith.constant 0 : i32
    %c16_i32 = arith.constant 16 : i32
    %6 = arith.muli %c0_i32, %c16_i32 : i32
    %7 = tpu.assume_multiple %6, 16 : i32
    %8 = arith.index_cast %7 : i32 to index
    %c0_11 = arith.constant 0 : index
    %9 = vector.load %arg1[%8, %c0_11] : memref<16x16xf32, #tpu.memory_space<vmem>>, vector<16x16xf32>
    %10 = arith.truncf %9 : vector<16x16xf32> to vector<16x16xbf16>
    %cst = arith.constant dense<0.000000e+00> : vector<16x128xf32>
    %11 = tpu.matmul %10, %0, %cst {dimension_numbers = #tpu.dot_dimension_numbers<[1], [0], [0], [1], [0, 0, 1, 1], [], []>} : vector<16x16xbf16>, vector<16x128xbf16>, vector<16x128xf32> -> vector<16x128xf32>
    %12 = vector.broadcast %1 : vector<1x128xf32> to vector<16x128xf32>
    %13 = arith.addf %11, %12 : vector<16x128xf32>
    %cst_12 = arith.constant 0.000000e+00 : f32
    %14 = vector.broadcast %cst_12 : f32 to vector<16x128xf32>
    %15 = arith.maximumf %13, %14 : vector<16x128xf32>
    %16 = arith.truncf %15 : vector<16x128xf32> to vector<16x128xbf16>
    %cst_13 = arith.constant dense<0.000000e+00> : vector<16x128xf32>
    %17 = tpu.matmul %16, %2, %cst_13 {dimension_numbers = #tpu.dot_dimension_numbers<[1], [0], [0], [1], [0, 0, 1, 1], [], []>} : vector<16x128xbf16>, vector<128x128xbf16>, vector<16x128xf32> -> vector<16x128xf32>
    %18 = vector.broadcast %3 : vector<1x128xf32> to vector<16x128xf32>
    %19 = arith.addf %17, %18 : vector<16x128xf32>
    %cst_14 = arith.constant 0.000000e+00 : f32
    %20 = vector.broadcast %cst_14 : f32 to vector<16x128xf32>
    %21 = arith.maximumf %19, %20 : vector<16x128xf32>
    %22 = arith.truncf %21 : vector<16x128xf32> to vector<16x128xbf16>
    %cst_15 = arith.constant dense<0.000000e+00> : vector<16x4xf32>
    %23 = tpu.matmul %22, %4, %cst_15 {dimension_numbers = #tpu.dot_dimension_numbers<[1], [0], [0], [1], [0, 0, 1, 1], [], []>} : vector<16x128xbf16>, vector<128x4xbf16>, vector<16x4xf32> -> vector<16x4xf32>
    %24 = vector.broadcast %5 : vector<1x4xf32> to vector<16x4xf32>
    %25 = arith.addf %23, %24 : vector<16x4xf32>
    %26 = arith.index_cast %7 : i32 to index
    %c0_16 = arith.constant 0 : index
    %27 = vector.load %arg8[%26, %c0_16] : memref<16x4xf32, #tpu.memory_space<vmem>>, vector<16x4xf32>
    tpu.vector_store %arg8[%26, %c0_16], %25 {strides = array<i32>} : memref<16x4xf32, #tpu.memory_space<vmem>>, vector<16x4xf32>,
    %c1_i32 = arith.constant 1 : i32
    return
  }
  func.func @transform_0(%arg0: i32) -> (i32, i32) {
    %c0_i32 = arith.constant 0 : i32
    %c0_i32_0 = arith.constant 0 : i32
    return %arg0, %c0_i32 : i32, i32
  }
  func.func @transform_1(%arg0: i32) -> (i32, i32) {
    %c0_i32 = arith.constant 0 : i32
    %c0_i32_0 = arith.constant 0 : i32
    %c0_i32_1 = arith.constant 0 : i32
    return %c0_i32, %c0_i32_0 : i32, i32
  }
  func.func @transform_2(%arg0: i32) -> (i32, i32) {
    %c0_i32 = arith.constant 0 : i32
    %c0_i32_0 = arith.constant 0 : i32
    %c0_i32_1 = arith.constant 0 : i32
    return %c0_i32, %c0_i32_0 : i32, i32
  }
  func.func @transform_3(%arg0: i32) -> (i32, i32) {
    %c0_i32 = arith.constant 0 : i32
    %c0_i32_0 = arith.constant 0 : i32
    %c0_i32_1 = arith.constant 0 : i32
    return %c0_i32, %c0_i32_0 : i32, i32
  }
  func.func @transform_4(%arg0: i32) -> (i32, i32) {
    %c0_i32 = arith.constant 0 : i32
    %c0_i32_0 = arith.constant 0 : i32
    %c0_i32_1 = arith.constant 0 : i32
    return %c0_i32, %c0_i32_0 : i32, i32
  }
  func.func @transform_5(%arg0: i32) -> (i32, i32) {
    %c0_i32 = arith.constant 0 : i32
    %c0_i32_0 = arith.constant 0 : i32
    %c0_i32_1 = arith.constant 0 : i32
    return %c0_i32, %c0_i32_0 : i32, i32
  }
  func.func @transform_6(%arg0: i32) -> (i32, i32) {
    %c0_i32 = arith.constant 0 : i32
    %c0_i32_0 = arith.constant 0 : i32
    %c0_i32_1 = arith.constant 0 : i32
    return %c0_i32, %c0_i32_0 : i32, i32
  }
  func.func @transform_7(%arg0: i32) -> (i32, i32) {
    %c0_i32 = arith.constant 0 : i32
    %c0_i32_0 = arith.constant 0 : i32
    return %arg0, %c0_i32 : i32, i32
  }
}

</mosaic_0001>

<bundles_post_ra>
// kernel: tpu_custom_call.1
= control target key start
LH: loop header
LB: loop body
LE: loop exit
PB: predicated region body
PF: predicated region fallthrough
CT: control target
= control target key end

     0   :  { %s810_s24 = smov 0   ;;  %s917_s0 = inlined_call_operand.vmem [shape: f32[64,16], index: 0, kind: input, shape index: {}]   ;;  %s918_s1 = inlined_call_operand.vmem [shape: bf16[16,128], index: 1, kind: input, shape index: {}]   ;;  %s919_s2 = inlined_call_operand.vmem [shape: f32[1,128], index: 2, kind: input, shape index: {}]   ;;  %s920_s3 = inlined_call_operand.vmem [shape: bf16[128,128], index: 3, kind: input, shape index: {}]   ;;  %s921_s4 = inlined_call_operand.vmem [shape: f32[1,128], index: 4, kind: input, shape index: {}]   ;;  %s922_s5 = inlined_call_operand.vmem [shape: bf16[128,4], index: 5, kind: input, shape index: {}]   ;;  %s923_s6 = inlined_call_operand.vmem [shape: f32[1,4], index: 6, kind: input, shape index: {}]   ;;  %s924_s7 = inlined_call_operand.vmem [shape: f32[64,4], index: 7, kind: output, shape index: {}]  }
   0x1 LB: > { %s635_s25 = sadd.s32 4294967295, %s766_s24   ;;  %p639_p0 = scmp.ge.s32.totalorder %s766_s24, 1  ;;  %s766_s24 = sphi %s810_s24, %s17_s24  }
   0x2   : > { %p238_p1 = scmp.lt.s32.totalorder %s766_s24, 5 }
   0x4   : > { %p239_p2 = pnand %p639_p0, %p238_p1 }
   0x5   : > { %s640_s28 = sshll.u32 (!%p239_p2), %s635_s25, 1 }
   0x6   : > { %242 = sbr.rel (%p239_p2) target bundleno = 623 (0x26f), region = 48  ;;  %p271_p3 = scmp.lt.s32.totalorder (!%p239_p2), %s640_s28, 7 }
   0xb   : > { %v743_v0 = vld [vmem:[%s918_s1] sm:$0xff]   ;;  %v768_v1 = vmov 0.0   ;;  %v744_v2 = vld [vmem:[%s920_s3 + $0x38] sm:$0xff]   ;;  %vm769_vm0 = vmmov 0   ;;  %v745_v3 = vld [vmem:[%s920_s3 + $0x30] sm:$0xff]   ;;  %s926_s28 = smov (!%p271_p3, %s640_s28), 7 }
   0xc   : > { %687 = vmatprep.subr.bf16.mxu0 %v768_v1  ;;  %693 = vmatprep.subr.bf16.mxu1 %v768_v1  ;;  %s641_s10 = sshll.u32 %s926_s28, 3  ;;  %v746_v4 = vld [vmem:[%s920_s3 + $0x28] sm:$0xff]   ;;  %vm335_vm1 = vcmask 130048   ;;  %v747_v8 = vld [vmem:[%s920_s3 + $0x20] sm:$0xff]   ;;  %v748_v9 = vld [vmem:[%s920_s3 + $0x18] sm:$0xff]   ;;  %vm576_vm2 = vcmask 31744  }
   0xd   : > { %688 = vmatpush3.bf16.msra.mxu0 %v743_v0  ;;  %689 = vmatprep.mubr.msk.bf16.mxu0 %vm769_vm0, %v768_v1  ;;  %s274_s15 = scalar_lea.vmem %s917_s0, %s641_s10  ;;  %v749_v10 = vld [vmem:[%s920_s3 + $0x10] sm:$0xff]   ;;  %v750_v11 = vld [vmem:[%s920_s3 + $0x8] sm:$0xff]   ;;  %v751_v12 = vld [vmem:[%s920_s3] sm:$0xff]   ;;  %s280_s9 = scalar_lea.vmem %s924_s7, %s641_s10 }
   0xe   : > { %694 = vmatpush3.bf16.msra.mxu1 %v744_v2  ;;  %709 = vmatprep.mubr.msk.bf16.mxu1 %vm769_vm0, %v768_v1  ;;  %v320_v5 = vld [vmem:[%s274_s15] sm:$0xff]  ;;  %v321_v6 = vld [vmem:[%s274_s15 + $0x8] sm:$0xff]  ;;  %v752_v13 = vld [vmem:[%s922_s5 + $0x38] sm:$0xff]  }
   0xf   : > { %695 = vmatprep.subr.bf16.mxu1 %v768_v1  ;;  %713 = vmatprep.subr.bf16.mxu0 %v768_v1  ;;  %v322_v7 = vpack.c.bf16 %v321_v6, %v320_v5  ;;  %v753_v14 = vld [vmem:[%s922_s5 + $0x30] sm:$0xff]   ;;  %v754_v15 = vld [vmem:[%s922_s5 + $0x28] sm:$0xff]   ;;  %v755_v16 = vld [vmem:[%s922_s5 + $0x20] sm:$0xff]  }
  0x10   : > { %v756_v17 = vld [vmem:[%s922_s5 + $0x18] sm:$0xff]   ;;  %v644_v18 = vld [vmem:[%s919_s2] ss:$0 sm:$0xff]  ;;  %v757_v28 = vld [vmem:[%s922_s5 + $0x10] sm:$0xff]  }
  0x11   : > { %690 = vmatmul.mubr.msk.bf16.vlgmr.msra.gmra.mxu0 %vm335_vm1, %v322_v7  ;;  %v758_v29 = vld [vmem:[%s922_s5 + $0x8] sm:$0xff]   ;;  %v759_v30 = vld [vmem:[%s922_s5] sm:$0xff]  }
  0x12   : > { %696 = vmatpush3.bf16.msra.mxu1 %v745_v3  ;;  %729 = vmatprep.mubr.msk.bf16.mxu0 %vm769_vm0, %v768_v1  ;;  %v647_v31 = vld [vmem:[%s921_s4] ss:$0 sm:$0xff] }
  0x13   : > { %697 = vmatprep.subr.bf16.mxu1 %v768_v1  ;;  %714 = vmatpush3.bf16.msra.mxu0 %v752_v13  ;;  %v656_v41 = vld [vmem:[%s923_s6] ss:$0 sm:$0xff] }
  0x14   : > { %715 = vmatprep.subr.bf16.mxu0 %v768_v1 }
  0x16   : > { %698 = vmatpush3.bf16.msra.mxu1 %v746_v4 }
  0x17   : > { %699 = vmatprep.subr.bf16.mxu1 %v768_v1  ;;  %716 = vmatpush3.bf16.msra.mxu0 %v753_v14 }
  0x18   : > { %717 = vmatprep.subr.bf16.mxu0 %v768_v1 }
  0x1a   : > { %700 = vmatpush3.bf16.msra.mxu1 %v747_v8 }
  0x1b   : > { %701 = vmatprep.subr.bf16.mxu1 %v768_v1  ;;  %718 = vmatpush3.bf16.msra.mxu0 %v754_v15 }
  0x1c   : > { %719 = vmatprep.subr.bf16.mxu0 %v768_v1 }
  0x1e   : > { %702 = vmatpush3.bf16.msra.mxu1 %v748_v9 }
  0x1f   : > { %703 = vmatprep.subr.bf16.mxu1 %v768_v1  ;;  %720 = vmatpush3.bf16.msra.mxu0 %v755_v16 }
  0x20   : > { %721 = vmatprep.subr.bf16.mxu0 %v768_v1 }
  0x22   : > { %704 = vmatpush3.bf16.msra.mxu1 %v749_v10 }
  0x23   : > { %705 = vmatprep.subr.bf16.mxu1 %v768_v1  ;;  %722 = vmatpush3.bf16.msra.mxu0 %v756_v17 }
  0x24   : > { %723 = vmatprep.subr.bf16.mxu0 %v768_v1 }
  0x26   : > { %706 = vmatpush3.bf16.msra.mxu1 %v750_v11 }
  0x27   : > { %707 = vmatprep.subr.bf16.mxu1 %v768_v1  ;;  %724 = vmatpush3.bf16.msra.mxu0 %v757_v28 }
  0x28   : > { %725 = vmatprep.subr.bf16.mxu0 %v768_v1 }
  0x2a   : > { %708 = vmatpush3.bf16.msra.mxu1 %v751_v12 }
  0x2b   : > { %726 = vmatpush3.bf16.msra.mxu0 %v758_v29 }
  0x2c   : > { %727 = vmatprep.subr.bf16.mxu0 %v768_v1 }
  0x2f   : > { %728 = vmatpush3.bf16.msra.mxu0 %v759_v30 }
  0xd1   : > { %v373_v19 = vpop.f32.mrf.mxu0 }
  0xd2   : > { %v374_v21 = vadd.f32 %v644_v18, %v373_v19 }
  0xd3   : > { %v691_v20 = vpop.f32.mrf.mxu0 }
  0xd4   : > { %v380_v25 = vmax.f32 %v374_v21, 0.0 }
  0xd5   : > { %v376_v22 = vpop.f32.mrf.mxu0 }
  0xd6   : > { %v377_v23 = vadd.f32 %v644_v18, %v376_v22 }
  0xd7   : > { %v692_v24 = vpop.f32.mrf.mxu0 }
  0xd8   : > { %v381_v26 = vmax.f32 %v377_v23, 0.0 }
  0xda   : > { %v382_v27 = vpack.c.bf16 %v381_v26, %v380_v25 }
  0xdc   : > { %710 = vmatmul.mubr.bf16.vlgmr.msra.gmra.mxu1 %v382_v27 }
 0x19c   : > { %v471_v32 = vpop.f32.mrf.mxu1 }
 0x19d   : > { %v472_v34 = vadd.f32 %v647_v31, %v471_v32 }
 0x19e   : > { %v711_v33 = vpop.f32.mrf.mxu1 }
 0x19f   : > { %v478_v38 = vmax.f32 %v472_v34, 0.0 }
 0x1a0   : > { %v474_v35 = vpop.f32.mrf.mxu1 }
 0x1a1   : > { %v475_v36 = vadd.f32 %v647_v31, %v474_v35 }
 0x1a2   : > { %v712_v37 = vpop.f32.mrf.mxu1 }
 0x1a3   : > { %v479_v39 = vmax.f32 %v475_v36, 0.0 }
 0x1a5   : > { %v480_v40 = vpack.c.bf16 %v479_v39, %v478_v38 }
 0x1a7   : > { %730 = vmatmul.mubr.bf16.vlgmr.msra.gmra.mxu0 %v480_v40 }
 0x267   : > { %v569_v42 = vpop.f32.mrf.mxu0 }
 0x268   : > { %v570_v43 = vadd.f32 %v656_v41, %v569_v42 }
 0x269   : > { %v731_v44 = vpop.f32.mrf.mxu0 }
 0x26a   : > { %577 = vst.msk [vmem:[%s280_s9] sm:$0xff] %vm576_vm2, %v570_v43 }
 0x26b   : > { %v572_v45 = vpop.f32.mrf.mxu0 }
 0x26c   : > { %v573_v46 = vadd.f32 %v656_v41, %v572_v45 }
 0x26d   : > { %v732_v47 = vpop.f32.mrf.mxu0 }
 0x26e   : > { %578 = vst.msk [vmem:[%s280_s9 + $0x8] sm:$0xff] %vm576_vm2, %v573_v46 }
 0x26f PF: > { %s17_s24 = sadd.s32 1, %s766_s24  }
 0x270   : > { %p14_p4 = scmp.ge.s32.totalorder %s17_s24, 6  }
 0x272   :  { %16 = sbr.rel (!%p14_p4) target bundleno = 1 (0x1), region = 78 }

</bundles_post_ra>
